<compile_context>
chip_gen: v7x
topology: tpu7x:2x2x1
jax: 0.10.0
libtpu: 0.0.40
codegen_flags: <defaults>
</compile_context>

<pallas_src>
import math

import jax
import jax.numpy as jnp
from jax.experimental import pallas as pl
from jax.experimental.pallas import tpu as pltpu

LANE = 128  # TPU vreg lane width


def _make_mlp_kernel(n_layers):
    """Fused MLP kernel body: refs = (x, w0, b0, ..., w{L-1}, b{L-1}, out).

    Weights arrive as bf16 (MXU-native), biases as f32. Matmuls accumulate in
    f32 on the MXU; bias-add / ReLU stay in f32 on the VPU. The last layer is
    lane-padded to LANE so the output store is a full, unmasked vst.
    """

    def kernel(*refs):
        x_ref = refs[0]
        o_ref = refs[-1]
        h = x_ref[...]                          # f32 (tb, in_dim)
        for i in range(n_layers):
            w = refs[1 + 2 * i][...]            # bf16 (in, out), VMEM-resident
            b = refs[2 + 2 * i][...]            # f32  (1, out)
            h = jnp.dot(h.astype(jnp.bfloat16), w,
                        preferred_element_type=jnp.float32)
            h = jnp.maximum(h + b, 0.0)         # f32 epilogue (ReLU every layer)
        o_ref[...] = h

    return kernel


def regression_network_forward(x, params, *, tb=256):
    """Fused MLP forward pass as one batch-tiled pallas_call.

    Args:
      x: (B, M) float32 input.
      params: output of prepare_params(): list of (W bf16 (in, out),
              b f32 (1, out)); the final layer's out-dim is zero-padded to LANE.
      tb: batch tile size (multiple of 8; 256 fills the v6e/v7x MXU M-dim).
    Returns:
      (B, 1) float32 predictions (ReLU after every layer incl. the last,
      matching the PyTorch module).
    """
    n_layers = len(params)
    B, M = x.shape
    out_pad = params[-1][0].shape[1]

    # Pad the batch so the grid covers it exactly (padded rows are discarded).
    n_tiles = pl.cdiv(B, tb)
    b_pad = n_tiles * tb
    if b_pad != B:
        x = jnp.pad(x, ((0, b_pad - B), (0, 0)))

    args = [x]
    in_specs = [pl.BlockSpec((tb, M), lambda i: (i, 0))]
    for w, b in params:
        args += [w, b]
        # Constant index_map → weights/biases are DMA'd once and stay in VMEM.
        in_specs += [pl.BlockSpec(w.shape, lambda i: (0, 0)),
                     pl.BlockSpec(b.shape, lambda i: (0, 0))]

    flops = 2 * b_pad * sum(int(w.shape[0]) * int(w.shape[1]) for w, _ in params)
    bytes_accessed = (x.size * x.dtype.itemsize
                      + sum(w.size * w.dtype.itemsize + b.size * b.dtype.itemsize
                            for w, b in params)
                      + b_pad * out_pad * 4)

    out = pl.pallas_call(
        _make_mlp_kernel(n_layers),
        out_shape=jax.ShapeDtypeStruct((b_pad, out_pad), jnp.float32),
        grid=(n_tiles,),
        in_specs=in_specs,
        out_specs=pl.BlockSpec((tb, out_pad), lambda i: (i, 0)),
        compiler_params=pltpu.CompilerParams(
            dimension_semantics=("parallel",)),   # shard batch tiles across TCs
        cost_estimate=pl.CostEstimate(flops=flops, transcendentals=0,
                                      bytes_accessed=bytes_accessed),
    )(*args)

    # Lane-dense (b_pad, 128) kernel output → the real (B, 1) prediction.
    return out[:B, :1]


def init_params(key, in_dim, hds, final_dim=1):
    """Deterministic f32 init mirroring torch.nn.Linear (uniform +/- 1/sqrt(fan_in))."""
    dims = [in_dim] + list(hds) + [final_dim]
    params = []
    for i in range(len(dims) - 1):
        fan_in, fan_out = dims[i], dims[i + 1]
        key, kw, kb = jax.random.split(key, 3)
        bound = 1.0 / math.sqrt(fan_in)
        w = jax.random.uniform(kw, (fan_in, fan_out), jnp.float32, -bound, bound)
        b = jax.random.uniform(kb, (1, fan_out), jnp.float32, -bound, bound)
        params.append((w, b))
    return params


def prepare_params(params_f32, lane_pad=LANE):
    """Cast weights to bf16 (MXU-native, half the HBM->VMEM bytes) and zero-pad
    the final layer's out-dim to a full lane width so the kernel output store is
    lane-dense. Padded columns have zero weight and zero bias → ReLU(0) = 0, and
    are sliced off in the wrapper, so semantics are unchanged."""
    prepped = []
    n = len(params_f32)
    for i, (w, b) in enumerate(params_f32):
        if i == n - 1 and w.shape[1] < lane_pad:
            pad = lane_pad - w.shape[1]
            w = jnp.pad(w, ((0, 0), (0, pad)))
            b = jnp.pad(b, ((0, 0), (0, pad)))
        prepped.append((w.astype(jnp.bfloat16), b.astype(jnp.float32)))
    return prepped


if __name__ == "__main__":
    # Module's `M` (input feature dim) is a global in the original file; pick M=32.
    M = 32
    hds = [64, 32]
    batch = 8

    key = jax.random.PRNGKey(0)
    key, kx = jax.random.split(key)
    x = jax.random.normal(kx, (batch, M), jnp.float32)

    params_f32 = init_params(key, M, hds, final_dim=1)
    params = prepare_params(params_f32)

    out = regression_network_forward(x, params, tb=256)
    out = jax.block_until_ready(out)

    # Reference: identical bf16-MXU / f32-accumulate forward in plain JAX.
    ref = x
    for w, b in params:
        ref = jnp.maximum(
            jnp.dot(ref.astype(jnp.bfloat16), w,
                    preferred_element_type=jnp.float32) + b, 0.0)
    ref = ref[:, :1]

    assert out.shape == (batch, 1)
    assert jnp.allclose(out, ref, atol=1e-3, rtol=1e-3), float(
        jnp.max(jnp.abs(out - ref)))

    # TODO(synk): loss_fn (censored L1 + L2 weight reg) is training-time logic,
    # not part of the module forward pass, and is left to plain JAX/optimizer code.
    print("KERNEL_OK")
</pallas_src>

<mosaic_0001>
module attributes {stable_mosaic.version = 11 : i64} {
  func.func @kernel(%arg0: i32, %arg1: memref<256x32xf32, #tpu.memory_space<vmem>>, %arg2: memref<32x64xbf16, #tpu.memory_space<vmem>>, %arg3: memref<1x64xf32, #tpu.memory_space<vmem>>, %arg4: memref<64x32xbf16, #tpu.memory_space<vmem>>, %arg5: memref<1x32xf32, #tpu.memory_space<vmem>>, %arg6: memref<32x128xbf16, #tpu.memory_space<vmem>>, %arg7: memref<1x128xf32, #tpu.memory_space<vmem>>, %arg8: memref<256x128xf32, #tpu.memory_space<vmem>>) attributes {dimension_semantics = [#tpu.dimension_semantics<parallel>], iteration_bounds = array<i64: 1>, scalar_prefetch = 0 : i64, scratch_operands = 0 : i64, tpu.core_type = #tpu.core_type<tc>, window_params = [{transform_indices = @transform_0, window_bounds = array<i64: 256, 32>}, {pipeline_mode = #tpu.pipeline_mode<synchronous>, transform_indices = @transform_1, window_bounds = array<i64: 32, 64>}, {pipeline_mode = #tpu.pipeline_mode<synchronous>, transform_indices = @transform_2, window_bounds = array<i64: 1, 64>}, {pipeline_mode = #tpu.pipeline_mode<synchronous>, transform_indices = @transform_3, window_bounds = array<i64: 64, 32>}, {pipeline_mode = #tpu.pipeline_mode<synchronous>, transform_indices = @transform_4, window_bounds = array<i64: 1, 32>}, {pipeline_mode = #tpu.pipeline_mode<synchronous>, transform_indices = @transform_5, window_bounds = array<i64: 32, 128>}, {pipeline_mode = #tpu.pipeline_mode<synchronous>, transform_indices = @transform_6, window_bounds = array<i64: 1, 128>}, {transform_indices = @transform_7, window_bounds = array<i64: 256, 128>}]} {
    %c0 = arith.constant 0 : index
    %c0_0 = arith.constant 0 : index
    %0 = vector.load %arg1[%c0, %c0_0] : memref<256x32xf32, #tpu.memory_space<vmem>>, vector<256x32xf32>
    %c0_1 = arith.constant 0 : index
    %c0_2 = arith.constant 0 : index
    %1 = vector.load %arg2[%c0_1, %c0_2] : memref<32x64xbf16, #tpu.memory_space<vmem>>, vector<32x64xbf16>
    %c0_3 = arith.constant 0 : index
    %c0_4 = arith.constant 0 : index
    %2 = vector.load %arg3[%c0_3, %c0_4] : memref<1x64xf32, #tpu.memory_space<vmem>>, vector<1x64xf32>
    %3 = arith.truncf %0 : vector<256x32xf32> to vector<256x32xbf16>
    %cst = arith.constant dense<0.000000e+00> : vector<256x64xf32>
    %4 = tpu.matmul %3, %1, %cst {dimension_numbers = #tpu.dot_dimension_numbers<[1], [0], [0], [1], [0, 0, 1, 1], [], []>} : vector<256x32xbf16>, vector<32x64xbf16>, vector<256x64xf32> -> vector<256x64xf32>
    %5 = vector.broadcast %2 : vector<1x64xf32> to vector<256x64xf32>
    %6 = arith.addf %4, %5 : vector<256x64xf32>
    %cst_5 = arith.constant 0.000000e+00 : f32
    %7 = vector.broadcast %cst_5 : f32 to vector<256x64xf32>
    %8 = arith.maximumf %6, %7 : vector<256x64xf32>
    %c0_6 = arith.constant 0 : index
    %c0_7 = arith.constant 0 : index
    %9 = vector.load %arg4[%c0_6, %c0_7] : memref<64x32xbf16, #tpu.memory_space<vmem>>, vector<64x32xbf16>
    %c0_8 = arith.constant 0 : index
    %c0_9 = arith.constant 0 : index
    %10 = vector.load %arg5[%c0_8, %c0_9] : memref<1x32xf32, #tpu.memory_space<vmem>>, vector<1x32xf32>
    %11 = arith.truncf %8 : vector<256x64xf32> to vector<256x64xbf16>
    %cst_10 = arith.constant dense<0.000000e+00> : vector<256x32xf32>
    %12 = tpu.matmul %11, %9, %cst_10 {dimension_numbers = #tpu.dot_dimension_numbers<[1], [0], [0], [1], [0, 0, 1, 1], [], []>} : vector<256x64xbf16>, vector<64x32xbf16>, vector<256x32xf32> -> vector<256x32xf32>
    %13 = vector.broadcast %10 : vector<1x32xf32> to vector<256x32xf32>
    %14 = arith.addf %12, %13 : vector<256x32xf32>
    %cst_11 = arith.constant 0.000000e+00 : f32
    %15 = vector.broadcast %cst_11 : f32 to vector<256x32xf32>
    %16 = arith.maximumf %14, %15 : vector<256x32xf32>
    %c0_12 = arith.constant 0 : index
    %c0_13 = arith.constant 0 : index
    %17 = vector.load %arg6[%c0_12, %c0_13] : memref<32x128xbf16, #tpu.memory_space<vmem>>, vector<32x128xbf16>
    %c0_14 = arith.constant 0 : index
    %c0_15 = arith.constant 0 : index
    %18 = vector.load %arg7[%c0_14, %c0_15] : memref<1x128xf32, #tpu.memory_space<vmem>>, vector<1x128xf32>
    %19 = arith.truncf %16 : vector<256x32xf32> to vector<256x32xbf16>
    %cst_16 = arith.constant dense<0.000000e+00> : vector<256x128xf32>
    %20 = tpu.matmul %19, %17, %cst_16 {dimension_numbers = #tpu.dot_dimension_numbers<[1], [0], [0], [1], [0, 0, 1, 1], [], []>} : vector<256x32xbf16>, vector<32x128xbf16>, vector<256x128xf32> -> vector<256x128xf32>
    %21 = vector.broadcast %18 : vector<1x128xf32> to vector<256x128xf32>
    %22 = arith.addf %20, %21 : vector<256x128xf32>
    %cst_17 = arith.constant 0.000000e+00 : f32
    %23 = vector.broadcast %cst_17 : f32 to vector<256x128xf32>
    %24 = arith.maximumf %22, %23 : vector<256x128xf32>
    %c0_18 = arith.constant 0 : index
    %c0_19 = arith.constant 0 : index
    %25 = vector.load %arg8[%c0_18, %c0_19] : memref<256x128xf32, #tpu.memory_space<vmem>>, vector<256x128xf32>
    tpu.vector_store %arg8[%c0_18, %c0_19], %24 {strides = array<i32>} : memref<256x128xf32, #tpu.memory_space<vmem>>, vector<256x128xf32>,
    return
  }
  func.func @transform_0(%arg0: i32) -> (i32, i32) {
    %c0_i32 = arith.constant 0 : i32
    %c0_i32_0 = arith.constant 0 : i32
    return %arg0, %c0_i32 : i32, i32
  }
  func.func @transform_1(%arg0: i32) -> (i32, i32) {
    %c0_i32 = arith.constant 0 : i32
    %c0_i32_0 = arith.constant 0 : i32
    %c0_i32_1 = arith.constant 0 : i32
    return %c0_i32, %c0_i32_0 : i32, i32
  }
  func.func @transform_2(%arg0: i32) -> (i32, i32) {
    %c0_i32 = arith.constant 0 : i32
    %c0_i32_0 = arith.constant 0 : i32
    %c0_i32_1 = arith.constant 0 : i32
    return %c0_i32, %c0_i32_0 : i32, i32
  }
  func.func @transform_3(%arg0: i32) -> (i32, i32) {
    %c0_i32 = arith.constant 0 : i32
    %c0_i32_0 = arith.constant 0 : i32
    %c0_i32_1 = arith.constant 0 : i32
    return %c0_i32, %c0_i32_0 : i32, i32
  }
  func.func @transform_4(%arg0: i32) -> (i32, i32) {
    %c0_i32 = arith.constant 0 : i32
    %c0_i32_0 = arith.constant 0 : i32
    %c0_i32_1 = arith.constant 0 : i32
    return %c0_i32, %c0_i32_0 : i32, i32
  }
  func.func @transform_5(%arg0: i32) -> (i32, i32) {
    %c0_i32 = arith.constant 0 : i32
    %c0_i32_0 = arith.constant 0 : i32
    %c0_i32_1 = arith.constant 0 : i32
    return %c0_i32, %c0_i32_0 : i32, i32
  }
  func.func @transform_6(%arg0: i32) -> (i32, i32) {
    %c0_i32 = arith.constant 0 : i32
    %c0_i32_0 = arith.constant 0 : i32
    %c0_i32_1 = arith.constant 0 : i32
    return %c0_i32, %c0_i32_0 : i32, i32
  }
  func.func @transform_7(%arg0: i32) -> (i32, i32) {
    %c0_i32 = arith.constant 0 : i32
    %c0_i32_0 = arith.constant 0 : i32
    return %arg0, %c0_i32 : i32, i32
  }
}

</mosaic_0001>

<bundles_post_ra>
// kernel: tpu_custom_call.1
= control target key start
LH: loop header
LB: loop body
LE: loop exit
PB: predicated region body
PF: predicated region fallthrough
CT: control target
= control target key end

     0   :  { %vm99_vm0 = vcmask 261120   ;;  %s1575_s0 = inlined_call_operand.vmem [shape: f32[256,32], index: 0, kind: input, shape index: {}]   ;;  %s1576_s1 = inlined_call_operand.vmem [shape: bf16[32,64], index: 1, kind: input, shape index: {}]   ;;  %s1577_s2 = inlined_call_operand.vmem [shape: f32[1,64], index: 2, kind: input, shape index: {}]   ;;  %s1578_s3 = inlined_call_operand.vmem [shape: bf16[64,32], index: 3, kind: input, shape index: {}]   ;;  %s1579_s4 = inlined_call_operand.vmem [shape: f32[1,32], index: 4, kind: input, shape index: {}]   ;;  %s1580_s5 = inlined_call_operand.vmem [shape: bf16[32,128], index: 5, kind: input, shape index: {}]   ;;  %s1581_s6 = inlined_call_operand.vmem [shape: f32[1,128], index: 6, kind: input, shape index: {}]   ;;  %s1582_s7 = inlined_call_operand.hbm [shape: f32[256,128], index: 7, kind: output, shape index: {}]  }
   0x1   :  { %v1200_v0 = vld [vmem:[%s1576_s1] sm:$0xff]   ;;  %v1201_v1 = vld [vmem:[%s1576_s1 + $0x8] sm:$0xff]   ;;  %v30_v5 = vld [vmem:[%s1575_s0 + $0x10] sm:$0xff] }
   0x2   :  { %1081 = vmatprep.subr.bf16.mxu0 %v1200_v0  ;;  %v28_v2 = vld [vmem:[%s1575_s0] sm:$0xff]  ;;  %v29_v3 = vld [vmem:[%s1575_s0 + $0x8] sm:$0xff]  ;;  %1193 = vmatprep.subr.bf16.mxu1 %v1200_v0  ;;  %v31_v6 = vld [vmem:[%s1575_s0 + $0x18] sm:$0xff] }
   0x3   :  { %1082 = vmatpush3.bf16.msra.mxu0 %v1200_v0  ;;  %v65_v4 = vpack.c.bf16 %v29_v3, %v28_v2  ;;  %1195 = vmatpush3.bf16.msra.mxu1 %v1200_v0  ;;  %v32_v7 = vld [vmem:[%s1575_s0 + $0x20] sm:$0xff]  ;;  %v33_v8 = vld [vmem:[%s1575_s0 + $0x28] sm:$0xff]  ;;  %v66_v9 = vpack.c.bf16 %v31_v6, %v30_v5  ;;  %v46_v14 = vld [vmem:[%s1575_s0 + $0x90] sm:$0xff] }
   0x4   :  { %1083 = vmatprep.subr.bf16.mxu0 %v1201_v1  ;;  %1194 = vmatprep.subr.bf16.mxu1 %v1201_v1  ;;  %v67_v10 = vpack.c.bf16 %v33_v8, %v32_v7  ;;  %v44_v11 = vld [vmem:[%s1575_s0 + $0x80] sm:$0xff]  ;;  %v45_v12 = vld [vmem:[%s1575_s0 + $0x88] sm:$0xff]  ;;  %v47_v15 = vld [vmem:[%s1575_s0 + $0x98] sm:$0xff] }
   0x5   :  { %1085 = vmatprep.mubr.msk.bf16.mxu0 %vm99_vm0, %v65_v4  ;;  %v73_v13 = vpack.c.bf16 %v45_v12, %v44_v11  ;;  %v48_v16 = vld [vmem:[%s1575_s0 + $0xa0] sm:$0xff]  ;;  %v74_v17 = vpack.c.bf16 %v47_v15, %v46_v14  ;;  %v49_v18 = vld [vmem:[%s1575_s0 + $0xa8] sm:$0xff]  ;;  %v34_v19 = vld [vmem:[%s1575_s0 + $0x30] sm:$0xff] }
   0x6   :  { %v35_v20 = vld [vmem:[%s1575_s0 + $0x38] sm:$0xff]  ;;  %v36_v21 = vld [vmem:[%s1575_s0 + $0x40] sm:$0xff]  ;;  %v75_v22 = vpack.c.bf16 %v49_v18, %v48_v16  ;;  %v37_v23 = vld [vmem:[%s1575_s0 + $0x48] sm:$0xff] }
   0x7   :  { %1084 = vmatpush3.bf16.msra.mxu0 %v1201_v1  ;;  %1196 = vmatpush3.bf16.msra.mxu1 %v1201_v1  ;;  %v50_v24 = vld [vmem:[%s1575_s0 + $0xb0] sm:$0xff]  ;;  %v51_v25 = vld [vmem:[%s1575_s0 + $0xb8] sm:$0xff]  ;;  %v52_v26 = vld [vmem:[%s1575_s0 + $0xc0] sm:$0xff]  ;;  %v68_v29 = vpack.c.bf16 %v35_v20, %v34_v19  ;;  %v69_v31 = vpack.c.bf16 %v37_v23, %v36_v21 }
   0x8   :  { %1101 = vmatprep.mubr.msk.bf16.mxu1 %vm99_vm0, %v73_v13  ;;  %v53_v27 = vld [vmem:[%s1575_s0 + $0xc8] sm:$0xff]  ;;  %v1202_v28 = vld [vmem:[%s1578_s3] sm:$0xff]   ;;  %v76_v32 = vpack.c.bf16 %v51_v25, %v50_v24  ;;  %v1204_v33 = vld [vmem:[%s1578_s3 + $0x10] sm:$0xff]  }
   0x9   :  { %v1203_v30 = vld [vmem:[%s1578_s3 + $0x8] sm:$0xff]   ;;  %1117 = vmatprep.subr.bf16.mxu1 %v1202_v28  ;;  %v77_v34 = vpack.c.bf16 %v53_v27, %v52_v26 }
   0xa   :  { %1086 = vmatmul.mubr.msk.bf16.vlgmr.msra.gmra.mrb[0].mxu0 %vm99_vm0, %v66_v9  ;;  %1102 = vmatmul.mubr.msk.bf16.vlgmr.msra.gmra.mrb[0].mxu1 %vm99_vm0, %v74_v17 }
   0xb   :  { %1089 = vmatprep.mubr.msk.bf16.mxu0 %vm99_vm0, %v67_v10  ;;  %1105 = vmatprep.mubr.msk.bf16.mxu1 %vm99_vm0, %v75_v22 }
   0xc   :  { %1118 = vmatpush3.bf16.msra.mxu1 %v1202_v28 }
   0xd   :  { %1119 = vmatprep.subr.bf16.mxu1 %v1203_v30 }
   0xe   :  { %12 = vsyncpa [#allocation3], 0  ;;  %v38_v35 = vld [vmem:[%s1575_s0 + $0x50] sm:$0xff]  ;;  %v39_v36 = vld [vmem:[%s1575_s0 + $0x58] sm:$0xff]  ;;  %vm396_vm1 = vcmask 523264  }
   0xf   :  { %v40_v37 = vld [vmem:[%s1575_s0 + $0x60] sm:$0xff]  ;;  %v41_v38 = vld [vmem:[%s1575_s0 + $0x68] sm:$0xff]  ;;  %v54_v39 = vld [vmem:[%s1575_s0 + $0xd0] sm:$0xff]  ;;  %v70_v43 = vpack.c.bf16 %v39_v36, %v38_v35 }
  0x10   :  { %v55_v40 = vld [vmem:[%s1575_s0 + $0xd8] sm:$0xff]  ;;  %1120 = vmatpush3.bf16.msra.mxu1 %v1203_v30  ;;  %v56_v41 = vld [vmem:[%s1575_s0 + $0xe0] sm:$0xff]  ;;  %v57_v42 = vld [vmem:[%s1575_s0 + $0xe8] sm:$0xff]  ;;  %v71_v44 = vpack.c.bf16 %v41_v38, %v40_v37 }
  0x11   :  { %1121 = vmatprep.subr.bf16.mxu1 %v1204_v33  ;;  %v78_v45 = vpack.c.bf16 %v55_v40, %v54_v39  ;;  %v79_v46 = vpack.c.bf16 %v57_v42, %v56_v41  ;;  %v42_v47 = vld [vmem:[%s1575_s0 + $0x70] sm:$0xff]  ;;  %v43_v48 = vld [vmem:[%s1575_s0 + $0x78] sm:$0xff]  ;;  %v1206_v54 = vld [vmem:[%s1580_s5] sm:$0xff]  }
  0x12   :  { %1090 = vmatmul.mubr.msk.bf16.gmra.mrb[4].mxu0 %vm99_vm0, %v68_v29  ;;  %1106 = vmatmul.mubr.msk.bf16.gmra.mrb[4].mxu1 %vm99_vm0, %v76_v32  ;;  %v58_v49 = vld [vmem:[%s1575_s0 + $0xf0] sm:$0xff]  ;;  %v59_v50 = vld [vmem:[%s1575_s0 + $0xf8] sm:$0xff]  ;;  %v72_v51 = vpack.c.bf16 %v43_v48, %v42_v47  ;;  %v1207_v55 = vld [vmem:[%s1580_s5 + $0x8] sm:$0xff]  }
  0x13   :  { %1093 = vmatprep.mubr.msk.bf16.mxu0 %vm99_vm0, %v69_v31  ;;  %1109 = vmatprep.mubr.msk.bf16.mxu1 %vm99_vm0, %v77_v34  ;;  %v80_v52 = vpack.c.bf16 %v59_v50, %v58_v49  ;;  %v1205_v53 = vld [vmem:[%s1578_s3 + $0x18] sm:$0xff]   ;;  %v1414_v56 = vld [vmem:[%s1577_s2] ss:$0 sm:$0xff] }
  0x14   :  { %1122 = vmatpush3.bf16.msra.mxu1 %v1204_v33  ;;  %1157 = vmatprep.subr.bf16.mxu0 %v1206_v54 }
  0x15   :  { %1123 = vmatprep.subr.bf16.mxu1 %v1205_v53  ;;  %1158 = vmatpush3.bf16.msra.mxu0 %v1206_v54 }
  0x16   :  { %1159 = vmatprep.subr.bf16.mxu0 %v1207_v55 }
  0x18   :  { %1124 = vmatpush3.bf16.msra.mxu1 %v1205_v53 }
  0x19   :  { %1160 = vmatpush3.bf16.msra.mxu0 %v1207_v55 }
  0x1a   :  { %1094 = vmatmul.mubr.msk.bf16.gmra.mrb[8].mxu0 %vm99_vm0, %v70_v43  ;;  %1110 = vmatmul.mubr.msk.bf16.gmra.mrb[8].mxu1 %vm99_vm0, %v78_v45 }
  0x1b   :  { %1097 = vmatprep.mubr.msk.bf16.mxu0 %vm99_vm0, %v71_v44  ;;  %1113 = vmatprep.mubr.msk.bf16.mxu1 %vm99_vm0, %v79_v46 }
  0x22   :  { %1098 = vmatmul.mubr.msk.bf16.gmra.mrb[12].mxu0 %vm99_vm0, %v72_v51  ;;  %1114 = vmatmul.mubr.msk.bf16.gmra.mrb[12].mxu1 %vm99_vm0, %v80_v52 }
  0xdd   :  { %v1087_v57 = vpop.f32.mrb[0].mxu0  ;;  %v1103_v60 = vpop.f32.mrb[0].mxu1 }
  0xde   :  { %v191_v58 = vadd.f32 %v1087_v57, %v1414_v56  ;;  %v182_v59 = vpop.f32.mrb[1].mxu0  ;;  %v255_v63 = vadd.f32 %v1103_v60, %v1414_v56  ;;  %v246_v0 = vpop.f32.mrb[1].mxu1 }
  0xdf   :  { %v183_v61 = vadd.f32 %v1414_v56, %v182_v59  ;;  %v1088_v62 = vpop.f32.mrb[2].mxu0  ;;  %v247_v3 = vadd.f32 %v1414_v56, %v246_v0  ;;  %v1104_v4 = vpop.f32.mrb[2].mxu1 }
  0xe0   :  { %v194_v1 = vadd.f32 %v1088_v62, %v1414_v56  ;;  %v185_v2 = vpop.f32.mrb[3].mxu0  ;;  %v327_v6 = vmax.f32 %v255_v63, 0.0  ;;  %v258_v7 = vadd.f32 %v1104_v4, %v1414_v56  ;;  %v249_v8 = vpop.f32.mrb[3].mxu1  ;;  %v311_v9 = vmax.f32 %v191_v58, 0.0 }
  0xe1   :  { %v186_v5 = vadd.f32 %v1414_v56, %v185_v2  ;;  %v325_v11 = vmax.f32 %v247_v3, 0.0  ;;  %v250_v12 = vadd.f32 %v1414_v56, %v249_v8  ;;  %v309_v13 = vmax.f32 %v183_v61, 0.0 }
  0xe2   :  { %v312_v10 = vmax.f32 %v194_v1, 0.0  ;;  %v328_v15 = vmax.f32 %v258_v7, 0.0 }
  0xe3   :  { %v310_v14 = vmax.f32 %v186_v5, 0.0  ;;  %v326_v17 = vmax.f32 %v250_v12, 0.0 }
  0xe4   :  { %v351_v16 = vpack.c.bf16 %v312_v10, %v311_v9  ;;  %v1424_v20 = vpack.c.bf16 %v328_v15, %v327_v6 }
  0xe5   :  { %v350_v18 = vpack.c.bf16 %v310_v14, %v309_v13  ;;  %v1091_v19 = vpop.f32.mrb[4].mxu0  ;;  %v1427_v23 = vpack.c.bf16 %v326_v17, %v325_v11  ;;  %v1107_v24 = vpop.f32.mrb[4].mxu1 }
  0xe6   :  { %v207_v21 = vadd.f32 %v1091_v19, %v1414_v56  ;;  %v198_v22 = vpop.f32.mrb[5].mxu0  ;;  %v271_v27 = vadd.f32 %v1107_v24, %v1414_v56  ;;  %v262_v28 = vpop.f32.mrb[5].mxu1 }
  0xe7   :  { %v199_v25 = vadd.f32 %v1414_v56, %v198_v22  ;;  %v1092_v26 = vpop.f32.mrb[6].mxu0  ;;  %1125 = vmatprep.mubr.msk.bf16.mxu1 %vm396_vm1, %v350_v18  ;;  %v263_v31 = vadd.f32 %v1414_v56, %v262_v28  ;;  %v1108_v32 = vpop.f32.mrb[6].mxu1 }
  0xe8   :  { %v210_v29 = vadd.f32 %v1092_v26, %v1414_v56  ;;  %v201_v30 = vpop.f32.mrb[7].mxu0  ;;  %1126 = vmatmul.mubr.msk.bf16.vlgmr.msra.gmra.mrb[16].mxu1 %vm396_vm1, %v351_v16  ;;  %v331_v34 = vmax.f32 %v271_v27, 0.0  ;;  %v274_v35 = vadd.f32 %v1108_v32, %v1414_v56  ;;  %v265_v36 = vpop.f32.mrb[7].mxu1  ;;  %v315_v37 = vmax.f32 %v207_v21, 0.0 }
  0xe9   :  { %v202_v33 = vadd.f32 %v1414_v56, %v201_v30  ;;  %v329_v39 = vmax.f32 %v263_v31, 0.0  ;;  %v266_v40 = vadd.f32 %v1414_v56, %v265_v36  ;;  %v313_v41 = vmax.f32 %v199_v25, 0.0 }
  0xea   :  { %v316_v38 = vmax.f32 %v210_v29, 0.0  ;;  %v332_v43 = vmax.f32 %v274_v35, 0.0 }
  0xeb   :  { %v314_v42 = vmax.f32 %v202_v33, 0.0  ;;  %v330_v45 = vmax.f32 %v266_v40, 0.0 }
  0xec   :  { %v353_v44 = vpack.c.bf16 %v316_v38, %v315_v37  ;;  %v1438_v48 = vpack.c.bf16 %v332_v43, %v331_v34 }
  0xed   :  { %v352_v46 = vpack.c.bf16 %v314_v42, %v313_v41  ;;  %v1095_v47 = vpop.f32.mrb[8].mxu0  ;;  %v360_v51 = vpack.c.bf16 %v330_v45, %v329_v39  ;;  %v1111_v52 = vpop.f32.mrb[8].mxu1 }
  0xee   :  { %v223_v49 = vadd.f32 %v1095_v47, %v1414_v56  ;;  %v214_v50 = vpop.f32.mrb[9].mxu0  ;;  %v287_v55 = vadd.f32 %v1111_v52, %v1414_v56  ;;  %v278_v57 = vpop.f32.mrb[9].mxu1 }
  0xef   :  { %v215_v53 = vadd.f32 %v1414_v56, %v214_v50  ;;  %v1096_v54 = vpop.f32.mrb[10].mxu0  ;;  %1129 = vmatprep.mubr.msk.bf16.mxu1 %vm396_vm1, %v352_v46  ;;  %v279_v60 = vadd.f32 %v1414_v56, %v278_v57  ;;  %v1112_v61 = vpop.f32.mrb[10].mxu1 }
  0xf0   :  { %v226_v58 = vadd.f32 %v1096_v54, %v1414_v56  ;;  %v217_v59 = vpop.f32.mrb[11].mxu0  ;;  %1130 = vmatmul.mubr.msk.bf16.gmra.mrb[20].mxu1 %vm396_vm1, %v353_v44  ;;  %v335_v63 = vmax.f32 %v287_v55, 0.0  ;;  %v290_v0 = vadd.f32 %v1112_v61, %v1414_v56  ;;  %v281_v1 = vpop.f32.mrb[11].mxu1  ;;  %v319_v2 = vmax.f32 %v223_v49, 0.0 }
  0xf1   :  { %v218_v62 = vadd.f32 %v1414_v56, %v217_v59  ;;  %v333_v4 = vmax.f32 %v279_v60, 0.0  ;;  %v282_v5 = vadd.f32 %v1414_v56, %v281_v1  ;;  %v317_v6 = vmax.f32 %v215_v53, 0.0 }
  0xf2   :  { %v320_v3 = vmax.f32 %v226_v58, 0.0  ;;  %v336_v8 = vmax.f32 %v290_v0, 0.0 }
  0xf3   :  { %v318_v7 = vmax.f32 %v218_v62, 0.0  ;;  %v334_v10 = vmax.f32 %v282_v5, 0.0 }
  0xf4   :  { %v355_v9 = vpack.c.bf16 %v320_v3, %v319_v2  ;;  %v363_v13 = vpack.c.bf16 %v336_v8, %v335_v63 }
  0xf5   :  { %v354_v11 = vpack.c.bf16 %v318_v7, %v317_v6  ;;  %v1099_v12 = vpop.f32.mrb[12].mxu0  ;;  %v362_v16 = vpack.c.bf16 %v334_v10, %v333_v4  ;;  %v1115_v17 = vpop.f32.mrb[12].mxu1 }
  0xf6   :  { %v239_v14 = vadd.f32 %v1099_v12, %v1414_v56  ;;  %v230_v15 = vpop.f32.mrb[13].mxu0  ;;  %v303_v21 = vadd.f32 %v1115_v17, %v1414_v56  ;;  %v294_v22 = vpop.f32.mrb[13].mxu1 }
  0xf7   :  { %v231_v18 = vadd.f32 %v1414_v56, %v230_v15  ;;  %v1100_v19 = vpop.f32.mrb[14].mxu0  ;;  %1133 = vmatprep.mubr.msk.bf16.mxu1 %vm396_vm1, %v354_v11  ;;  %v295_v26 = vadd.f32 %v1414_v56, %v294_v22  ;;  %v1116_v27 = vpop.f32.mrb[14].mxu1 }
  0xf8   :  { %v242_v24 = vadd.f32 %v1100_v19, %v1414_v56  ;;  %v233_v25 = vpop.f32.mrb[15].mxu0  ;;  %1134 = vmatmul.mubr.msk.bf16.gmra.mrb[24].mxu1 %vm396_vm1, %v355_v9  ;;  %v339_v29 = vmax.f32 %v303_v21, 0.0  ;;  %v306_v30 = vadd.f32 %v1116_v27, %v1414_v56  ;;  %v297_v31 = vpop.f32.mrb[15].mxu1  ;;  %v323_v32 = vmax.f32 %v239_v14, 0.0 }
  0xf9   :  { %v234_v28 = vadd.f32 %v1414_v56, %v233_v25  ;;  %v337_v34 = vmax.f32 %v295_v26, 0.0  ;;  %v298_v35 = vadd.f32 %v1414_v56, %v297_v31  ;;  %v321_v36 = vmax.f32 %v231_v18, 0.0  ;;  %v1476_v56 = vld [vmem:[%s1579_s4] ss:$0 sm:$0xff] }
  0xfa   :  { %v324_v33 = vmax.f32 %v242_v24, 0.0  ;;  %v340_v38 = vmax.f32 %v306_v30, 0.0 }
  0xfb   :  { %v322_v37 = vmax.f32 %v234_v28, 0.0  ;;  %v338_v40 = vmax.f32 %v298_v35, 0.0 }
  0xfc   :  { %v357_v39 = vpack.c.bf16 %v324_v33, %v323_v32  ;;  %v365_v42 = vpack.c.bf16 %v340_v38, %v339_v29 }
  0xfd   :  { %v356_v41 = vpack.c.bf16 %v322_v37, %v321_v36  ;;  %v364_v43 = vpack.c.bf16 %v338_v40, %v337_v34 }
  0xff   :  { %1137 = vmatprep.mubr.msk.bf16.mxu1 %vm396_vm1, %v356_v41 }
 0x100   :  { %1138 = vmatmul.mubr.msk.bf16.gmra.mrb[28].mxu1 %vm396_vm1, %v357_v39 }
 0x101   :  { %1141 = vmatprep.mubr.msk.bf16.mxu1 %vm396_vm1, %v1427_v23 }
 0x108   :  { %1142 = vmatmul.mubr.msk.bf16.gmra.mrb[32].mxu1 %vm396_vm1, %v1424_v20 }
 0x109   :  { %1145 = vmatprep.mubr.msk.bf16.mxu1 %vm396_vm1, %v360_v51 }
 0x110   :  { %1146 = vmatmul.mubr.msk.bf16.gmra.mrb[36].mxu1 %vm396_vm1, %v1438_v48 }
 0x111   :  { %1149 = vmatprep.mubr.msk.bf16.mxu1 %vm396_vm1, %v362_v16 }
 0x118   :  { %1150 = vmatmul.mubr.msk.bf16.gmra.mrb[40].mxu1 %vm396_vm1, %v363_v13 }
 0x119   :  { %1153 = vmatprep.mubr.msk.bf16.mxu1 %vm396_vm1, %v364_v43 }
 0x120   :  { %1154 = vmatmul.mubr.msk.bf16.gmra.mrb[44].mxu1 %vm396_vm1, %v365_v42 }
 0x1bb   :  { %v1127_v23 = vpop.f32.mrb[16].mxu1 }
 0x1bc   :  { %v488_v20 = vadd.f32 %v1127_v23, %v1476_v56  ;;  %v479_v44 = vpop.f32.mrb[17].mxu1 }
 0x1bd   :  { %v480_v45 = vadd.f32 %v1476_v56, %v479_v44  ;;  %v1128_v46 = vpop.f32.mrb[18].mxu1 }
 0x1be   :  { %v491_v47 = vadd.f32 %v1128_v46, %v1476_v56  ;;  %v482_v48 = vpop.f32.mrb[19].mxu1  ;;  %v608_v50 = vmax.f32 %v488_v20, 0.0 }
 0x1bf   :  { %v483_v49 = vadd.f32 %v1476_v56, %v482_v48  ;;  %v606_v52 = vmax.f32 %v480_v45, 0.0 }
 0x1c0   :  { %v609_v51 = vmax.f32 %v491_v47, 0.0 }
 0x1c1   :  { %v607_v53 = vmax.f32 %v483_v49, 0.0 }
 0x1c2   :  { %v644_v54 = vpack.c.bf16 %v609_v51, %v608_v50 }
 0x1c3   :  { %v643_v55 = vpack.c.bf16 %v607_v53, %v606_v52  ;;  %v1131_v57 = vpop.f32.mrb[20].mxu1 }
 0x1c4   :  { %v504_v58 = vadd.f32 %v1131_v57, %v1476_v56  ;;  %v495_v59 = vpop.f32.mrb[21].mxu1 }
 0x1c5   :  { %v496_v60 = vadd.f32 %v1476_v56, %v495_v59  ;;  %v1132_v61 = vpop.f32.mrb[22].mxu1  ;;  %1161 = vmatprep.mubr.msk.bf16.mxu0 %vm99_vm0, %v643_v55 }
 0x1c6   :  { %v507_v62 = vadd.f32 %v1132_v61, %v1476_v56  ;;  %v498_v63 = vpop.f32.mrb[23].mxu1  ;;  %1162 = vmatmul.mubr.msk.bf16.vlgmr.msra.gmra.mrb[16].mxu0 %vm99_vm0, %v644_v54  ;;  %v612_v1 = vmax.f32 %v504_v58, 0.0 }
 0x1c7   :  { %v499_v0 = vadd.f32 %v1476_v56, %v498_v63  ;;  %v610_v3 = vmax.f32 %v496_v60, 0.0 }
 0x1c8   :  { %v613_v2 = vmax.f32 %v507_v62, 0.0 }
 0x1c9   :  { %v611_v4 = vmax.f32 %v499_v0, 0.0 }
 0x1ca   :  { %v646_v5 = vpack.c.bf16 %v613_v2, %v612_v1 }
 0x1cb   :  { %v645_v6 = vpack.c.bf16 %v611_v4, %v610_v3  ;;  %v1135_v7 = vpop.f32.mrb[24].mxu1 }
 0x1cc   :  { %v520_v8 = vadd.f32 %v1135_v7, %v1476_v56  ;;  %v511_v9 = vpop.f32.mrb[25].mxu1 }
 0x1cd   :  { %v512_v10 = vadd.f32 %v1476_v56, %v511_v9  ;;  %v1136_v11 = vpop.f32.mrb[26].mxu1  ;;  %1165 = vmatprep.mubr.msk.bf16.mxu0 %vm99_vm0, %v645_v6 }
 0x1ce   :  { %v523_v12 = vadd.f32 %v1136_v11, %v1476_v56  ;;  %v514_v13 = vpop.f32.mrb[27].mxu1  ;;  %1166 = vmatmul.mubr.msk.bf16.gmra.mrb[20].mxu0 %vm99_vm0, %v646_v5  ;;  %v616_v15 = vmax.f32 %v520_v8, 0.0 }
 0x1cf   :  { %v515_v14 = vadd.f32 %v1476_v56, %v514_v13  ;;  %v614_v17 = vmax.f32 %v512_v10, 0.0 }
 0x1d0   :  { %v617_v16 = vmax.f32 %v523_v12, 0.0 }
 0x1d1   :  { %v615_v18 = vmax.f32 %v515_v14, 0.0 }
 0x1d2   :  { %v648_v19 = vpack.c.bf16 %v617_v16, %v616_v15 }
 0x1d3   :  { %v647_v21 = vpack.c.bf16 %v615_v18, %v614_v17  ;;  %v1139_v22 = vpop.f32.mrb[28].mxu1 }
 0x1d4   :  { %v536_v24 = vadd.f32 %v1139_v22, %v1476_v56  ;;  %v527_v25 = vpop.f32.mrb[29].mxu1 }
 0x1d5   :  { %v528_v26 = vadd.f32 %v1476_v56, %v527_v25  ;;  %v1140_v27 = vpop.f32.mrb[30].mxu1  ;;  %1169 = vmatprep.mubr.msk.bf16.mxu0 %vm99_vm0, %v647_v21 }
 0x1d6   :  { %v539_v28 = vadd.f32 %v1140_v27, %v1476_v56  ;;  %v530_v29 = vpop.f32.mrb[31].mxu1  ;;  %1170 = vmatmul.mubr.msk.bf16.gmra.mrb[24].mxu0 %vm99_vm0, %v648_v19  ;;  %v620_v31 = vmax.f32 %v536_v24, 0.0 }
 0x1d7   :  { %v531_v30 = vadd.f32 %v1476_v56, %v530_v29  ;;  %v618_v33 = vmax.f32 %v528_v26, 0.0 }
 0x1d8   :  { %v621_v32 = vmax.f32 %v539_v28, 0.0 }
 0x1d9   :  { %v619_v34 = vmax.f32 %v531_v30, 0.0  ;;  %v1529_v30 = vld [vmem:[%s1581_s6] ss:$0 sm:$0xff]  ;;  %s1232_s6 = smov [#allocation2]  }
 0x1da   :  { %v650_v35 = vpack.c.bf16 %v621_v32, %v620_v31  ;;  %s955_s10 = sshll.u32 %s1232_s6, 4  ;;  %s956_s10 = int_to_ptr.vmem [resolvable:$true] %s955_s10 }
 0x1db   :  { %v649_v36 = vpack.c.bf16 %v619_v34, %v618_v33  ;;  %v1143_v37 = vpop.f32.mrb[32].mxu1  ;;  %s1208_s11 = scalar_lea.vmem %s956_s10, 4096  ;;  %p1213_p1 = scmp.lt.s32.totalorder %s956_s10, %s956_s10 }
 0x1dc   :  { %v552_v38 = vadd.f32 %v1143_v37, %v1476_v56  ;;  %v543_v39 = vpop.f32.mrb[33].mxu1  ;;  %p1209_p0 = scmp.ne.s32.totalorder %s956_s10, %s1208_s11  ;;  %p1214_p2 = scmp.lt.s32.totalorder %s1208_s11, %s1208_s11 }
 0x1dd   :  { %v544_v40 = vadd.f32 %v1476_v56, %v543_v39  ;;  %v1144_v41 = vpop.f32.mrb[34].mxu1  ;;  %1173 = vmatprep.mubr.msk.bf16.mxu0 %vm99_vm0, %v649_v36 }
 0x1de   :  { %v555_v42 = vadd.f32 %v1144_v41, %v1476_v56  ;;  %v546_v43 = vpop.f32.mrb[35].mxu1  ;;  %1174 = vmatmul.mubr.msk.bf16.gmra.mrb[28].mxu0 %vm99_vm0, %v650_v35  ;;  %v624_v20 = vmax.f32 %v552_v38, 0.0  ;;  %p1215_p3 = por %p1214_p2, %p1213_p1 }
 0x1df   :  { %v547_v23 = vadd.f32 %v1476_v56, %v546_v43  ;;  %v622_v45 = vmax.f32 %v544_v40, 0.0 }
 0x1e0   :  { %v625_v44 = vmax.f32 %v555_v42, 0.0  ;;  %p1216_p4 = pnand %p1215_p3, %p1209_p0 }
 0x1e1   :  { %v623_v46 = vmax.f32 %v547_v23, 0.0 }
 0x1e2   :  { %v652_v47 = vpack.c.bf16 %v625_v44, %v624_v20 }
 0x1e3   :  { %v651_v48 = vpack.c.bf16 %v623_v46, %v622_v45  ;;  %v1147_v49 = vpop.f32.mrb[36].mxu1 }
 0x1e4   :  { %v568_v50 = vadd.f32 %v1147_v49, %v1476_v56  ;;  %v559_v51 = vpop.f32.mrb[37].mxu1 }
 0x1e5   :  { %v560_v52 = vadd.f32 %v1476_v56, %v559_v51  ;;  %v1148_v53 = vpop.f32.mrb[38].mxu1  ;;  %1177 = vmatprep.mubr.msk.bf16.mxu0 %vm99_vm0, %v651_v48 }
 0x1e6   :  { %v571_v54 = vadd.f32 %v1148_v53, %v1476_v56  ;;  %v562_v55 = vpop.f32.mrb[39].mxu1  ;;  %1178 = vmatmul.mubr.msk.bf16.gmra.mrb[32].mxu0 %vm99_vm0, %v652_v47  ;;  %v628_v58 = vmax.f32 %v568_v50, 0.0 }
 0x1e7   :  { %v563_v57 = vadd.f32 %v1476_v56, %v562_v55  ;;  %v626_v60 = vmax.f32 %v560_v52, 0.0 }
 0x1e8   :  { %v629_v59 = vmax.f32 %v571_v54, 0.0 }
 0x1e9   :  { %v627_v61 = vmax.f32 %v563_v57, 0.0 }
 0x1ea   :  { %v654_v62 = vpack.c.bf16 %v629_v59, %v628_v58 }
 0x1eb   :  { %v653_v63 = vpack.c.bf16 %v627_v61, %v626_v60  ;;  %v1151_v0 = vpop.f32.mrb[40].mxu1 }
 0x1ec   :  { %v584_v1 = vadd.f32 %v1151_v0, %v1476_v56  ;;  %v575_v2 = vpop.f32.mrb[41].mxu1 }
 0x1ed   :  { %v576_v3 = vadd.f32 %v1476_v56, %v575_v2  ;;  %v1152_v4 = vpop.f32.mrb[42].mxu1  ;;  %1181 = vmatprep.mubr.msk.bf16.mxu0 %vm99_vm0, %v653_v63 }
 0x1ee   :  { %v587_v5 = vadd.f32 %v1152_v4, %v1476_v56  ;;  %v578_v6 = vpop.f32.mrb[43].mxu1  ;;  %1182 = vmatmul.mubr.msk.bf16.gmra.mrb[36].mxu0 %vm99_vm0, %v654_v62  ;;  %v632_v8 = vmax.f32 %v584_v1, 0.0 }
 0x1ef   :  { %v579_v7 = vadd.f32 %v1476_v56, %v578_v6  ;;  %v630_v10 = vmax.f32 %v576_v3, 0.0 }
 0x1f0   :  { %v633_v9 = vmax.f32 %v587_v5, 0.0 }
 0x1f1   :  { %v631_v11 = vmax.f32 %v579_v7, 0.0 }
 0x1f2   :  { %v656_v12 = vpack.c.bf16 %v633_v9, %v632_v8 }
 0x1f3   :  { %v655_v13 = vpack.c.bf16 %v631_v11, %v630_v10  ;;  %v1155_v14 = vpop.f32.mrb[44].mxu1 }
 0x1f4   :  { %v600_v15 = vadd.f32 %v1155_v14, %v1476_v56  ;;  %v591_v16 = vpop.f32.mrb[45].mxu1 }
 0x1f5   :  { %v592_v17 = vadd.f32 %v1476_v56, %v591_v16  ;;  %v1156_v18 = vpop.f32.mrb[46].mxu1  ;;  %1185 = vmatprep.mubr.msk.bf16.mxu0 %vm99_vm0, %v655_v13 }
 0x1f6   :  { %v603_v19 = vadd.f32 %v1156_v18, %v1476_v56  ;;  %v594_v21 = vpop.f32.mrb[47].mxu1  ;;  %1186 = vmatmul.mubr.msk.bf16.gmra.mrb[40].mxu0 %vm99_vm0, %v656_v12  ;;  %v636_v24 = vmax.f32 %v600_v15, 0.0 }
 0x1f7   :  { %v595_v22 = vadd.f32 %v1476_v56, %v594_v21  ;;  %v634_v26 = vmax.f32 %v592_v17, 0.0 }
 0x1f8   :  { %v637_v25 = vmax.f32 %v603_v19, 0.0 }
 0x1f9   :  { %v635_v27 = vmax.f32 %v595_v22, 0.0 }
 0x1fa   :  { %v658_v28 = vpack.c.bf16 %v637_v25, %v636_v24 }
 0x1fb   :  { %v657_v29 = vpack.c.bf16 %v635_v27, %v634_v26 }
 0x1fd   :  { %1189 = vmatprep.mubr.msk.bf16.mxu0 %vm99_vm0, %v657_v29 }
 0x1fe   :  { %1190 = vmatmul.mubr.msk.bf16.gmra.mrb[44].mxu0 %vm99_vm0, %v658_v28 }
 0x299   :  { %v1163_v31 = vpop.f32.mrb[16].mxu0 }
 0x29a   :  { %v768_v32 = vadd.f32 %v1163_v31, %v1529_v30  ;;  %v759_v33 = vpop.f32.mrb[17].mxu0 }
 0x29b   :  { %v760_v56 = vadd.f32 %v1529_v30, %v759_v33  ;;  %v1164_v34 = vpop.f32.mrb[18].mxu0 }
 0x29c   :  { %v888_v35 = vmax.f32 %v768_v32, 0.0  ;;  %v771_v36 = vadd.f32 %v1164_v34, %v1529_v30  ;;  %v762_v37 = vpop.f32.mrb[19].mxu0 }
 0x29d   :  { %v886_v38 = vmax.f32 %v760_v56, 0.0  ;;  %v763_v39 = vadd.f32 %v1529_v30, %v762_v37 }
 0x29e   :  { %920 = vst [vmem:[#allocation2 + $0x10] sm:$0xff] %v888_v35  ;;  %v889_v40 = vmax.f32 %v771_v36, 0.0 }
 0x29f   :  { %918 = vst [vmem:[#allocation2] sm:$0xff] %v886_v38  ;;  %v887_v41 = vmax.f32 %v763_v39, 0.0 }
 0x2a0   :  { %921 = vst [vmem:[#allocation2 + $0x18] sm:$0xff] %v889_v40 }
 0x2a1   :  { %919 = vst [vmem:[#allocation2 + $0x8] sm:$0xff] %v887_v41  ;;  %v1167_v42 = vpop.f32.mrb[20].mxu0 }
 0x2a2   :  { %v784_v43 = vadd.f32 %v1167_v42, %v1529_v30  ;;  %v775_v23 = vpop.f32.mrb[21].mxu0 }
 0x2a3   :  { %v776_v20 = vadd.f32 %v1529_v30, %v775_v23  ;;  %v1168_v44 = vpop.f32.mrb[22].mxu0 }
 0x2a4   :  { %v892_v45 = vmax.f32 %v784_v43, 0.0  ;;  %v787_v46 = vadd.f32 %v1168_v44, %v1529_v30  ;;  %v778_v47 = vpop.f32.mrb[23].mxu0 }
 0x2a5   :  { %v890_v48 = vmax.f32 %v776_v20, 0.0  ;;  %v779_v49 = vadd.f32 %v1529_v30, %v778_v47 }
 0x2a6   :  { %924 = vst [vmem:[#allocation2 + $0x30] sm:$0xff] %v892_v45  ;;  %v893_v50 = vmax.f32 %v787_v46, 0.0 }
 0x2a7   :  { %922 = vst [vmem:[#allocation2 + $0x20] sm:$0xff] %v890_v48  ;;  %v891_v51 = vmax.f32 %v779_v49, 0.0 }
 0x2a8   :  { %925 = vst [vmem:[#allocation2 + $0x38] sm:$0xff] %v893_v50 }
 0x2a9   :  { %923 = vst [vmem:[#allocation2 + $0x28] sm:$0xff] %v891_v51  ;;  %v1171_v52 = vpop.f32.mrb[24].mxu0 }
 0x2aa   :  { %v800_v53 = vadd.f32 %v1171_v52, %v1529_v30  ;;  %v791_v54 = vpop.f32.mrb[25].mxu0 }
 0x2ab   :  { %v792_v55 = vadd.f32 %v1529_v30, %v791_v54  ;;  %v1172_v57 = vpop.f32.mrb[26].mxu0 }
 0x2ac   :  { %v896_v58 = vmax.f32 %v800_v53, 0.0  ;;  %v803_v59 = vadd.f32 %v1172_v57, %v1529_v30  ;;  %v794_v60 = vpop.f32.mrb[27].mxu0 }
 0x2ad   :  { %v894_v61 = vmax.f32 %v792_v55, 0.0  ;;  %v795_v62 = vadd.f32 %v1529_v30, %v794_v60 }
 0x2ae   :  { %928 = vst [vmem:[#allocation2 + $0x50] sm:$0xff] %v896_v58  ;;  %v897_v63 = vmax.f32 %v803_v59, 0.0 }
 0x2af   :  { %926 = vst [vmem:[#allocation2 + $0x40] sm:$0xff] %v894_v61  ;;  %v895_v0 = vmax.f32 %v795_v62, 0.0 }
 0x2b0   :  { %929 = vst [vmem:[#allocation2 + $0x58] sm:$0xff] %v897_v63 }
 0x2b1   :  { %927 = vst [vmem:[#allocation2 + $0x48] sm:$0xff] %v895_v0  ;;  %v1175_v1 = vpop.f32.mrb[28].mxu0 }
 0x2b2   :  { %v816_v2 = vadd.f32 %v1175_v1, %v1529_v30  ;;  %v807_v3 = vpop.f32.mrb[29].mxu0 }
 0x2b3   :  { %v808_v4 = vadd.f32 %v1529_v30, %v807_v3  ;;  %v1176_v5 = vpop.f32.mrb[30].mxu0 }
 0x2b4   :  { %v900_v6 = vmax.f32 %v816_v2, 0.0  ;;  %v819_v7 = vadd.f32 %v1176_v5, %v1529_v30  ;;  %v810_v8 = vpop.f32.mrb[31].mxu0 }
 0x2b5   :  { %v898_v9 = vmax.f32 %v808_v4, 0.0  ;;  %v811_v10 = vadd.f32 %v1529_v30, %v810_v8 }
 0x2b6   :  { %932 = vst [vmem:[#allocation2 + $0x70] sm:$0xff] %v900_v6  ;;  %v901_v11 = vmax.f32 %v819_v7, 0.0 }
 0x2b7   :  { %930 = vst [vmem:[#allocation2 + $0x60] sm:$0xff] %v898_v9  ;;  %v899_v12 = vmax.f32 %v811_v10, 0.0 }
 0x2b8   :  { %933 = vst [vmem:[#allocation2 + $0x78] sm:$0xff] %v901_v11 }
 0x2b9   :  { %931 = vst [vmem:[#allocation2 + $0x68] sm:$0xff] %v899_v12  ;;  %v1179_v13 = vpop.f32.mrb[32].mxu0 }
 0x2ba   :  { %v832_v14 = vadd.f32 %v1179_v13, %v1529_v30  ;;  %v823_v15 = vpop.f32.mrb[33].mxu0 }
 0x2bb   :  { %v824_v16 = vadd.f32 %v1529_v30, %v823_v15  ;;  %v1180_v17 = vpop.f32.mrb[34].mxu0 }
 0x2bc   :  { %v904_v18 = vmax.f32 %v832_v14, 0.0  ;;  %v835_v19 = vadd.f32 %v1180_v17, %v1529_v30  ;;  %v826_v21 = vpop.f32.mrb[35].mxu0 }
 0x2bd   :  { %v902_v22 = vmax.f32 %v824_v16, 0.0  ;;  %v827_v24 = vadd.f32 %v1529_v30, %v826_v21 }
 0x2be   :  { %936 = vst [vmem:[#allocation2 + $0x90] sm:$0xff] %v904_v18  ;;  %v905_v25 = vmax.f32 %v835_v19, 0.0 }
 0x2bf   :  { %934 = vst [vmem:[#allocation2 + $0x80] sm:$0xff] %v902_v22  ;;  %v903_v26 = vmax.f32 %v827_v24, 0.0 }
 0x2c0   :  { %937 = vst [vmem:[#allocation2 + $0x98] sm:$0xff] %v905_v25 }
 0x2c1   :  { %935 = vst [vmem:[#allocation2 + $0x88] sm:$0xff] %v903_v26  ;;  %v1183_v27 = vpop.f32.mrb[36].mxu0 }
 0x2c2   :  { %v848_v28 = vadd.f32 %v1183_v27, %v1529_v30  ;;  %v839_v29 = vpop.f32.mrb[37].mxu0 }
 0x2c3   :  { %v840_v31 = vadd.f32 %v1529_v30, %v839_v29  ;;  %v1184_v32 = vpop.f32.mrb[38].mxu0 }
 0x2c4   :  { %v908_v33 = vmax.f32 %v848_v28, 0.0  ;;  %v851_v56 = vadd.f32 %v1184_v32, %v1529_v30  ;;  %v842_v34 = vpop.f32.mrb[39].mxu0 }
 0x2c5   :  { %v906_v35 = vmax.f32 %v840_v31, 0.0  ;;  %v843_v36 = vadd.f32 %v1529_v30, %v842_v34 }
 0x2c6   :  { %940 = vst [vmem:[#allocation2 + $0xb0] sm:$0xff] %v908_v33  ;;  %v909_v37 = vmax.f32 %v851_v56, 0.0 }
 0x2c7   :  { %938 = vst [vmem:[#allocation2 + $0xa0] sm:$0xff] %v906_v35  ;;  %v907_v38 = vmax.f32 %v843_v36, 0.0 }
 0x2c8   :  { %941 = vst [vmem:[#allocation2 + $0xb8] sm:$0xff] %v909_v37 }
 0x2c9   :  { %939 = vst [vmem:[#allocation2 + $0xa8] sm:$0xff] %v907_v38  ;;  %v1187_v39 = vpop.f32.mrb[40].mxu0 }
 0x2ca   :  { %v864_v40 = vadd.f32 %v1187_v39, %v1529_v30  ;;  %v855_v41 = vpop.f32.mrb[41].mxu0 }
 0x2cb   :  { %v856_v42 = vadd.f32 %v1529_v30, %v855_v41  ;;  %v1188_v43 = vpop.f32.mrb[42].mxu0 }
 0x2cc   :  { %v912_v23 = vmax.f32 %v864_v40, 0.0  ;;  %v867_v20 = vadd.f32 %v1188_v43, %v1529_v30  ;;  %v858_v44 = vpop.f32.mrb[43].mxu0 }
 0x2cd   :  { %v910_v45 = vmax.f32 %v856_v42, 0.0  ;;  %v859_v46 = vadd.f32 %v1529_v30, %v858_v44 }
 0x2ce   :  { %944 = vst [vmem:[#allocation2 + $0xd0] sm:$0xff] %v912_v23  ;;  %v913_v47 = vmax.f32 %v867_v20, 0.0 }
 0x2cf   :  { %942 = vst [vmem:[#allocation2 + $0xc0] sm:$0xff] %v910_v45  ;;  %v911_v48 = vmax.f32 %v859_v46, 0.0 }
 0x2d0   :  { %945 = vst [vmem:[#allocation2 + $0xd8] sm:$0xff] %v913_v47 }
 0x2d1   :  { %943 = vst [vmem:[#allocation2 + $0xc8] sm:$0xff] %v911_v48  ;;  %v1191_v49 = vpop.f32.mrb[44].mxu0 }
 0x2d2   :  { %v880_v50 = vadd.f32 %v1191_v49, %v1529_v30  ;;  %v871_v51 = vpop.f32.mrb[45].mxu0 }
 0x2d3   :  { %v872_v52 = vadd.f32 %v1529_v30, %v871_v51  ;;  %v1192_v53 = vpop.f32.mrb[46].mxu0 }
 0x2d4   :  { %v916_v54 = vmax.f32 %v880_v50, 0.0  ;;  %v883_v55 = vadd.f32 %v1192_v53, %v1529_v30  ;;  %v874_v57 = vpop.f32.mrb[47].mxu0 }
 0x2d5   :  { %v914_v58 = vmax.f32 %v872_v52, 0.0  ;;  %v875_v59 = vadd.f32 %v1529_v30, %v874_v57 }
 0x2d6   :  { %948 = vst [vmem:[#allocation2 + $0xf0] sm:$0xff] %v916_v54  ;;  %v917_v60 = vmax.f32 %v883_v55, 0.0 }
 0x2d7   :  { %946 = vst [vmem:[#allocation2 + $0xe0] sm:$0xff] %v914_v58  ;;  %v915_v61 = vmax.f32 %v875_v59, 0.0 }
 0x2d8   :  { %949 = vst [vmem:[#allocation2 + $0xf8] sm:$0xff] %v917_v60 }
 0x2d9   :  { %947 = vst [vmem:[#allocation2 + $0xe8] sm:$0xff] %v915_v61 }
 0x2da   :  { %1219 = shalt.err (!%p1216_p4)
}
 0x2db   :  { %s1220_s13 = scalar_lea.hbm %s1582_s7, 4096 }
 0x2dc   :  { %p1221_p5 = scmp.ne.s32.totalorder %s1582_s7, %s1220_s13  ;;  %p1224_p6 = scmp.lt.u32.totalorder %s1220_s13, %s1582_s7 }
 0x2de   :  { %p1226_p7 = pnand %p1224_p6, %p1221_p5 }
 0x2e0   :  { %1229 = shalt.err (!%p1226_p7)
}
 0x2e1   :  { %s1233_s18 = smov 128   ;;  %s1234_s19 = smov 8  }
 0x2e2   :  { %961 = dma.vmem_to_hbm [thread:$0]  %s956_s10, 4096, %s1582_s7, [#allocation3], %s1233_s18, %s1233_s18, %s1234_s19  }
 0x2e3   :  { %1230 = dma.done.wait [#allocation3], 4096  }
 0x2e4   :  { %1231 = vsyncadd [#allocation3], 4294963200 }
 0x2e5   :  { %965 = vsyncpa [#allocation3], 1 }

</bundles_post_ra>
